<compile_context>
chip_gen: v7x
topology: tpu7x:2x2x1
jax: 0.10.0
libtpu: 0.0.40
codegen_flags: <defaults>
</compile_context>

<pallas_src>
import functools

import numpy as np

import jax
import jax.numpy as jnp
from jax.experimental import pallas as pl
from jax.experimental.pallas import tpu as pltpu


def _cluster_loss_kernel(*refs, margin, inv_k, ids_per_batch, imgs_per_id):
    P, K = ids_per_batch, imgs_per_id
    feat_refs = refs[:K]           # K x (P, TD), native dtype: image k of every id
    out_ref = refs[K]              # (R, 128) f32 packed result
    gg_acc = refs[K + 1]           # (P, P) f32: centers Gram matrix accumulator
    q_accs = refs[K + 2:]          # K x (P, 1) f32: sum_d (f - c)^2 per image

    d = pl.program_id(0)

    @pl.when(d == 0)
    def _init():
        gg_acc[...] = jnp.zeros_like(gg_acc)
        for q in q_accs:
            q[...] = jnp.zeros_like(q)

    # Class centers for this D tile: mean over the K images of each id.
    # (Plain VPU adds; no mask operand, no near-empty MXU matmul.)
    centers = feat_refs[0][...].astype(jnp.float32)
    for k in range(1, K):
        centers = centers + feat_refs[k][...].astype(jnp.float32)
    centers = centers * inv_k                                    # (P, TD) f32

    # Center Gram matrix (for inter-class distances), f32 on the MXU.
    gg_acc[...] += jax.lax.dot_general(
        centers, centers, (((1,), (1,)), ((), ())),
        preferred_element_type=jnp.float32)                      # (P, P)

    # Per-image squared distance to its own center, accumulated over D tiles
    # (direct (f - c)^2 sum -> no cancellation, only the block diagonal of
    # the old (B, P) feature<->center matrix is ever computed).
    for k in range(K):
        diff = feat_refs[k][...].astype(jnp.float32) - centers   # (P, TD)
        q_accs[k][...] += jnp.sum(diff * diff, axis=1, keepdims=True)

    @pl.when(d == pl.num_programs(0) - 1)
    def _finalize():
        gg = gg_acc[...]                                         # (P, P)
        rows = jax.lax.broadcasted_iota(jnp.int32, (P, P), 0)
        cols = jax.lax.broadcasted_iota(jnp.int32, (P, P), 1)
        eye = rows == cols
        gg_diag = jnp.where(eye, gg, 0.0)
        cc_col = jnp.sum(gg_diag, axis=1, keepdims=True)         # (P, 1) |c_p|^2
        cc_row = jnp.sum(gg_diag, axis=0, keepdims=True)         # (1, P)

        # intra: max over the K images of squared own-center distance; sqrt
        # is monotone, so it only touches the reduced (P, 1) result.
        intra2 = q_accs[0][...]
        for k in range(1, K):
            intra2 = jnp.maximum(intra2, q_accs[k][...])         # (P, 1)
        intra = jnp.sqrt(jnp.maximum(intra2, 1e-12))

        # inter: min over other centers of squared center<->center distance.
        d2_cc = cc_col + cc_row - 2.0 * gg                       # (P, P)
        inter2 = jnp.min(jnp.where(eye, jnp.inf, d2_cc),
                         axis=1, keepdims=True)                  # (P, 1)
        inter = jnp.sqrt(jnp.maximum(inter2, 1e-12))

        hinge = jnp.maximum(intra - inter + margin, 0.0)         # (P, 1)
        loss = jnp.sum(hinge, axis=0, keepdims=True) * (1.0 / P)  # (1, 1)

        # Single full, unmasked (R, 128) store built entirely in registers:
        #   lane 0 -> intra, lane 1 -> inter, lane 2 -> loss (broadcast).
        out_rows, out_w = out_ref.shape
        if out_rows > P:                                         # trace-time pad
            pad = jnp.zeros((out_rows - P, 1), jnp.float32)
            intra = jnp.concatenate([intra, pad], axis=0)
            inter = jnp.concatenate([inter, pad], axis=0)
        lane = jax.lax.broadcasted_iota(jnp.int32, (out_rows, out_w), 1)
        out_ref[...] = jnp.where(lane == 0, intra,
                       jnp.where(lane == 1, inter,
                       jnp.where(lane == 2, loss, 0.0)))


def _pick_tile_d(D, B, itemsize):
    # Prefer a single grid step (full D): each grid step costs ~0.35us of
    # fixed pipeline overhead, which dwarfs DMA+compute for these tiny
    # (P, tile_d) blocks; the double-buffered feature windows use
    # 2*B*tile_d*itemsize bytes, far below scoped-VMEM limits on v5e/v6e/v7x.
    budget = 12 * 1024 * 1024
    per_col = 2 * B * itemsize          # K specs x 2 buffers x P rows
    if D * per_col <= budget:
        return D
    for cand in (8192, 4096, 2048, 1024, 512, 256, 128):
        if D % cand == 0 and cand * per_col <= budget:
            return cand
    return D


def cluster_loss(features, targets, *, margin=10.0, ids_per_batch=16,
                 imgs_per_id=4, ordered=True, tile_d=None):
    """JAX/Pallas equivalent of ClusterLoss.forward (ordered P*K batches)."""
    B, D = features.shape
    assert B == targets.shape[0], "features.size(0) is not equal to targets.size(0)"
    # TODO(synk): the un-ordered / mismatched-batch path uses torch.unique
    # (data-dependent number of classes); only the ordered P*K layout is
    # supported here.
    assert ordered and B == ids_per_batch * imgs_per_id
    P, K = ids_per_batch, imgs_per_id

    # Best-effort validation of the ordered-layout precondition (each K-row
    # block holds exactly one id and blocks hold distinct ids) when targets
    # is a concrete array; skipped silently under tracing.
    try:
        tgt_np = np.asarray(targets).reshape(P, K)
    except Exception:
        tgt_np = None
    if tgt_np is not None:
        assert (tgt_np == tgt_np[:, :1]).all(), (
            "ordered=True requires each block of imgs_per_id rows to share one id")
        assert np.unique(tgt_np[:, 0]).size == P, (
            "ordered=True requires distinct ids across the P blocks")

    itemsize = jnp.dtype(features.dtype).itemsize
    if tile_d is None:
        tile_d = _pick_tile_d(D, B, itemsize)
    assert D % tile_d == 0 and (tile_d == D or tile_d % 128 == 0)
    grid_d = D // tile_d

    # Free row-major reshape: row p = [img0 | img1 | ... | img_{K-1}] of id p.
    feats_pkd = features.reshape(P, K * D)

    out_rows = max(8, ((P + 7) // 8) * 8)
    out_w = 128

    kernel = functools.partial(
        _cluster_loss_kernel, margin=float(margin), inv_k=1.0 / float(K),
        ids_per_batch=P, imgs_per_id=K)

    # One BlockSpec per image slot, all reading the same HBM array.
    in_specs = [
        pl.BlockSpec((P, tile_d), (lambda d, _k=k: (0, _k * grid_d + d)))
        for k in range(K)
    ]

    cost = pl.CostEstimate(
        flops=2 * P * P * D + 4 * B * D,
        transcendentals=2 * P,
        bytes_accessed=B * D * itemsize + out_rows * out_w * 4)

    out = pl.pallas_call(
        kernel,
        out_shape=jax.ShapeDtypeStruct((out_rows, out_w), jnp.float32),
        grid_spec=pltpu.PrefetchScalarGridSpec(
            num_scalar_prefetch=0,
            grid=(grid_d,),
            in_specs=in_specs,
            out_specs=pl.BlockSpec((out_rows, out_w), lambda d: (0, 0)),
            scratch_shapes=[pltpu.VMEM((P, P), jnp.float32)]
                          + [pltpu.VMEM((P, 1), jnp.float32)] * K),
        compiler_params=pltpu.CompilerParams(
            dimension_semantics=("arbitrary",)),
        cost_estimate=cost,
    )(*([feats_pkd] * K))

    # TODO(synk): at much larger B (>=512) add a leading "parallel" grid axis
    # over id groups so v7x's second TensorCore is used; at these sizes the
    # split overhead exceeds the work, so one core + max block size wins.
    return out[0, 2], out[:P, 0], out[:P, 1]


def _reference(features, targets, margin, imgs_per_id):
    """Pure-JAX f32 reference mirroring the PyTorch code."""
    features = features.astype(jnp.float32)
    labels = targets[::imgs_per_id]
    mask = (labels[:, None] == targets[None, :]).astype(jnp.float32)     # (P, B)
    centers = (mask @ features) / mask.sum(1, keepdims=True)             # (P, D)

    def edist(x, y):
        xx = jnp.sum(x * x, 1, keepdims=True)
        yy = jnp.sum(y * y, 1, keepdims=True).T
        d2 = xx + yy - 2.0 * (x @ y.T)
        return jnp.sqrt(jnp.clip(d2, 1e-12))

    d_cf = edist(centers, features)                                      # (P, B)
    intra = jnp.max(jnp.where(mask > 0, d_cf, -jnp.inf), axis=1)
    d_cc = edist(centers, centers)                                       # (P, P)
    eye = jnp.eye(labels.shape[0], dtype=bool)
    inter = jnp.min(jnp.where(eye, jnp.inf, d_cc), axis=1)
    loss = jnp.mean(jax.nn.relu(intra - inter + margin))
    return loss, intra, inter


if __name__ == "__main__":
    # Ordered P*K batch with the module's default geometry: 16 ids x 4 images,
    # 256-dim features (B = 64).
    ids_per_batch, imgs_per_id, D = 16, 4, 256
    B = ids_per_batch * imgs_per_id
    margin = 10.0

    key = jax.random.PRNGKey(0)
    features = jax.random.normal(key, (B, D), dtype=jnp.float32)
    labels = jnp.arange(ids_per_batch, dtype=jnp.int32) * 5 + 2
    targets = jnp.repeat(labels, imgs_per_id)

    # f32 path, full-D single grid step (the preferred configuration).
    loss, dist_ap, dist_an = cluster_loss(
        features, targets, margin=margin,
        ids_per_batch=ids_per_batch, imgs_per_id=imgs_per_id)
    jax.block_until_ready((loss, dist_ap, dist_an))

    ref_loss, ref_ap, ref_an = _reference(features, targets, margin, imgs_per_id)
    assert jnp.allclose(loss, ref_loss, atol=5e-3, rtol=5e-3)
    assert jnp.allclose(dist_ap, ref_ap, atol=5e-3, rtol=5e-3)
    assert jnp.allclose(dist_an, ref_an, atol=5e-3, rtol=5e-3)

    # Multi-step D pipeline path (tile_d=128 -> 2 accumulated grid steps).
    loss2, ap2, an2 = cluster_loss(
        features, targets, margin=margin,
        ids_per_batch=ids_per_batch, imgs_per_id=imgs_per_id, tile_d=128)
    jax.block_until_ready((loss2, ap2, an2))
    assert jnp.allclose(loss2, ref_loss, atol=5e-3, rtol=5e-3)
    assert jnp.allclose(ap2, ref_ap, atol=5e-3, rtol=5e-3)
    assert jnp.allclose(an2, ref_an, atol=5e-3, rtol=5e-3)

    # bf16 path: native-dtype HBM DMA; centers and all accumulation stay f32.
    feat_bf16 = features.astype(jnp.bfloat16)
    loss16, ap16, an16 = cluster_loss(
        feat_bf16, targets, margin=margin,
        ids_per_batch=ids_per_batch, imgs_per_id=imgs_per_id)
    jax.block_until_ready((loss16, ap16, an16))
    ref_loss16, ref_ap16, ref_an16 = _reference(feat_bf16, targets, margin, imgs_per_id)
    assert jnp.allclose(loss16, ref_loss16, atol=5e-2, rtol=2e-2)
    assert jnp.allclose(ap16, ref_ap16, atol=5e-2, rtol=2e-2)
    assert jnp.allclose(an16, ref_an16, atol=5e-2, rtol=2e-2)

    print("KERNEL_OK")
</pallas_src>

<mosaic_0001>
module attributes {stable_mosaic.version = 11 : i64} {
  func.func @_cluster_loss_kernel(%arg0: i32, %arg1: memref<16x256xf32, #tpu.memory_space<vmem>>, %arg2: memref<16x256xf32, #tpu.memory_space<vmem>>, %arg3: memref<16x256xf32, #tpu.memory_space<vmem>>, %arg4: memref<16x256xf32, #tpu.memory_space<vmem>>, %arg5: memref<16x128xf32, #tpu.memory_space<vmem>>, %arg6: memref<16x16xf32, #tpu.memory_space<vmem>>, %arg7: memref<16x1xf32, #tpu.memory_space<vmem>>, %arg8: memref<16x1xf32, #tpu.memory_space<vmem>>, %arg9: memref<16x1xf32, #tpu.memory_space<vmem>>, %arg10: memref<16x1xf32, #tpu.memory_space<vmem>>) attributes {dimension_semantics = [#tpu.dimension_semantics<arbitrary>], iteration_bounds = array<i64: 1>, scalar_prefetch = 0 : i64, scratch_operands = 5 : i64, tpu.core_type = #tpu.core_type<tc>, window_params = [{transform_indices = @transform_0, window_bounds = array<i64: 16, 256>}, {transform_indices = @transform_1, window_bounds = array<i64: 16, 256>}, {transform_indices = @transform_2, window_bounds = array<i64: 16, 256>}, {transform_indices = @transform_3, window_bounds = array<i64: 16, 256>}, {pipeline_mode = #tpu.pipeline_mode<synchronous>, transform_indices = @transform_4, window_bounds = array<i64: 16, 128>}]} {
    %c0_i32 = arith.constant 0 : i32
    %0 = arith.cmpi eq, %arg0, %c0_i32 : i32
    %1 = arith.extui %0 : i1 to i32
    %c0_i32_0 = arith.constant 0 : i32
    %2 = arith.cmpi ne, %1, %c0_i32_0 : i32
    scf.if %2 {
      %cst_43 = arith.constant 0.000000e+00 : f32
      %51 = vector.broadcast %cst_43 : f32 to vector<16x16xf32>
      %c0_44 = arith.constant 0 : index
      %c0_45 = arith.constant 0 : index
      %52 = vector.load %arg6[%c0_44, %c0_45] : memref<16x16xf32, #tpu.memory_space<vmem>>, vector<16x16xf32>
      tpu.vector_store %arg6[%c0_44, %c0_45], %51 {strides = array<i32>} : memref<16x16xf32, #tpu.memory_space<vmem>>, vector<16x16xf32>,
      %cst_46 = arith.constant 0.000000e+00 : f32
      %53 = vector.broadcast %cst_46 : f32 to vector<16x1xf32>
      %c0_47 = arith.constant 0 : index
      %c0_48 = arith.constant 0 : index
      %54 = vector.load %arg7[%c0_47, %c0_48] : memref<16x1xf32, #tpu.memory_space<vmem>>, vector<16x1xf32>
      tpu.vector_store %arg7[%c0_47, %c0_48], %53 {strides = array<i32>} : memref<16x1xf32, #tpu.memory_space<vmem>>, vector<16x1xf32>,
      %cst_49 = arith.constant 0.000000e+00 : f32
      %55 = vector.broadcast %cst_49 : f32 to vector<16x1xf32>
      %c0_50 = arith.constant 0 : index
      %c0_51 = arith.constant 0 : index
      %56 = vector.load %arg8[%c0_50, %c0_51] : memref<16x1xf32, #tpu.memory_space<vmem>>, vector<16x1xf32>
      tpu.vector_store %arg8[%c0_50, %c0_51], %55 {strides = array<i32>} : memref<16x1xf32, #tpu.memory_space<vmem>>, vector<16x1xf32>,
      %cst_52 = arith.constant 0.000000e+00 : f32
      %57 = vector.broadcast %cst_52 : f32 to vector<16x1xf32>
      %c0_53 = arith.constant 0 : index
      %c0_54 = arith.constant 0 : index
      %58 = vector.load %arg9[%c0_53, %c0_54] : memref<16x1xf32, #tpu.memory_space<vmem>>, vector<16x1xf32>
      tpu.vector_store %arg9[%c0_53, %c0_54], %57 {strides = array<i32>} : memref<16x1xf32, #tpu.memory_space<vmem>>, vector<16x1xf32>,
      %cst_55 = arith.constant 0.000000e+00 : f32
      %59 = vector.broadcast %cst_55 : f32 to vector<16x1xf32>
      %c0_56 = arith.constant 0 : index
      %c0_57 = arith.constant 0 : index
      %60 = vector.load %arg10[%c0_56, %c0_57] : memref<16x1xf32, #tpu.memory_space<vmem>>, vector<16x1xf32>
      tpu.vector_store %arg10[%c0_56, %c0_57], %59 {strides = array<i32>} : memref<16x1xf32, #tpu.memory_space<vmem>>, vector<16x1xf32>,
    } else {
    }
    %c0 = arith.constant 0 : index
    %c0_1 = arith.constant 0 : index
    %3 = vector.load %arg1[%c0, %c0_1] : memref<16x256xf32, #tpu.memory_space<vmem>>, vector<16x256xf32>
    %c0_2 = arith.constant 0 : index
    %c0_3 = arith.constant 0 : index
    %4 = vector.load %arg2[%c0_2, %c0_3] : memref<16x256xf32, #tpu.memory_space<vmem>>, vector<16x256xf32>
    %5 = arith.addf %3, %4 : vector<16x256xf32>
    %c0_4 = arith.constant 0 : index
    %c0_5 = arith.constant 0 : index
    %6 = vector.load %arg3[%c0_4, %c0_5] : memref<16x256xf32, #tpu.memory_space<vmem>>, vector<16x256xf32>
    %7 = arith.addf %5, %6 : vector<16x256xf32>
    %c0_6 = arith.constant 0 : index
    %c0_7 = arith.constant 0 : index
    %8 = vector.load %arg4[%c0_6, %c0_7] : memref<16x256xf32, #tpu.memory_space<vmem>>, vector<16x256xf32>
    %9 = arith.addf %7, %8 : vector<16x256xf32>
    %cst = arith.constant 2.500000e-01 : f32
    %10 = vector.broadcast %cst : f32 to vector<16x256xf32>
    %11 = arith.mulf %9, %10 : vector<16x256xf32>
    %c0_8 = arith.constant 0 : index
    %c0_9 = arith.constant 0 : index
    %12 = vector.load %arg6[%c0_8, %c0_9] : memref<16x16xf32, #tpu.memory_space<vmem>>, vector<16x16xf32>
    %cst_10 = arith.constant dense<0.000000e+00> : vector<16x16xf32>
    %13 = tpu.matmul %11, %11, %cst_10 {dimension_numbers = #tpu.dot_dimension_numbers<[1], [1], [0], [0], [0, 0, 1, 0], [], []>} : vector<16x256xf32>, vector<16x256xf32>, vector<16x16xf32> -> vector<16x16xf32>
    %14 = arith.addf %12, %13 : vector<16x16xf32>
    %c0_11 = arith.constant 0 : index
    %c0_12 = arith.constant 0 : index
    %15 = vector.load %arg6[%c0_11, %c0_12] : memref<16x16xf32, #tpu.memory_space<vmem>>, vector<16x16xf32>
    tpu.vector_store %arg6[%c0_11, %c0_12], %14 {strides = array<i32>} : memref<16x16xf32, #tpu.memory_space<vmem>>, vector<16x16xf32>,
    %c0_13 = arith.constant 0 : index
    %c0_14 = arith.constant 0 : index
    %16 = vector.load %arg1[%c0_13, %c0_14] : memref<16x256xf32, #tpu.memory_space<vmem>>, vector<16x256xf32>
    %17 = arith.subf %16, %11 : vector<16x256xf32>
    %c0_15 = arith.constant 0 : index
    %c0_16 = arith.constant 0 : index
    %18 = vector.load %arg7[%c0_15, %c0_16] : memref<16x1xf32, #tpu.memory_space<vmem>>, vector<16x1xf32>
    %19 = arith.mulf %17, %17 : vector<16x256xf32>
    %cst_17 = arith.constant dense<0.000000e+00> : vector<16xf32>
    %20 = vector.multi_reduction <add>, %19, %cst_17 [1] : vector<16x256xf32> to vector<16xf32>
    %21 = vector.shape_cast %20 : vector<16xf32> to vector<16x1xf32>
    %22 = arith.addf %18, %21 : vector<16x1xf32>
    %c0_18 = arith.constant 0 : index
    %c0_19 = arith.constant 0 : index
    %23 = vector.load %arg7[%c0_18, %c0_19] : memref<16x1xf32, #tpu.memory_space<vmem>>, vector<16x1xf32>
    tpu.vector_store %arg7[%c0_18, %c0_19], %22 {strides = array<i32>} : memref<16x1xf32, #tpu.memory_space<vmem>>, vector<16x1xf32>,
    %c0_20 = arith.constant 0 : index
    %c0_21 = arith.constant 0 : index
    %24 = vector.load %arg2[%c0_20, %c0_21] : memref<16x256xf32, #tpu.memory_space<vmem>>, vector<16x256xf32>
    %25 = arith.subf %24, %11 : vector<16x256xf32>
    %c0_22 = arith.constant 0 : index
    %c0_23 = arith.constant 0 : index
    %26 = vector.load %arg8[%c0_22, %c0_23] : memref<16x1xf32, #tpu.memory_space<vmem>>, vector<16x1xf32>
    %27 = arith.mulf %25, %25 : vector<16x256xf32>
    %cst_24 = arith.constant dense<0.000000e+00> : vector<16xf32>
    %28 = vector.multi_reduction <add>, %27, %cst_24 [1] : vector<16x256xf32> to vector<16xf32>
    %29 = vector.shape_cast %28 : vector<16xf32> to vector<16x1xf32>
    %30 = arith.addf %26, %29 : vector<16x1xf32>
    %c0_25 = arith.constant 0 : index
    %c0_26 = arith.constant 0 : index
    %31 = vector.load %arg8[%c0_25, %c0_26] : memref<16x1xf32, #tpu.memory_space<vmem>>, vector<16x1xf32>
    tpu.vector_store %arg8[%c0_25, %c0_26], %30 {strides = array<i32>} : memref<16x1xf32, #tpu.memory_space<vmem>>, vector<16x1xf32>,
    %c0_27 = arith.constant 0 : index
    %c0_28 = arith.constant 0 : index
    %32 = vector.load %arg3[%c0_27, %c0_28] : memref<16x256xf32, #tpu.memory_space<vmem>>, vector<16x256xf32>
    %33 = arith.subf %32, %11 : vector<16x256xf32>
    %c0_29 = arith.constant 0 : index
    %c0_30 = arith.constant 0 : index
    %34 = vector.load %arg9[%c0_29, %c0_30] : memref<16x1xf32, #tpu.memory_space<vmem>>, vector<16x1xf32>
    %35 = arith.mulf %33, %33 : vector<16x256xf32>
    %cst_31 = arith.constant dense<0.000000e+00> : vector<16xf32>
    %36 = vector.multi_reduction <add>, %35, %cst_31 [1] : vector<16x256xf32> to vector<16xf32>
    %37 = vector.shape_cast %36 : vector<16xf32> to vector<16x1xf32>
    %38 = arith.addf %34, %37 : vector<16x1xf32>
    %c0_32 = arith.constant 0 : index
    %c0_33 = arith.constant 0 : index
    %39 = vector.load %arg9[%c0_32, %c0_33] : memref<16x1xf32, #tpu.memory_space<vmem>>, vector<16x1xf32>
    tpu.vector_store %arg9[%c0_32, %c0_33], %38 {strides = array<i32>} : memref<16x1xf32, #tpu.memory_space<vmem>>, vector<16x1xf32>,
    %c0_34 = arith.constant 0 : index
    %c0_35 = arith.constant 0 : index
    %40 = vector.load %arg4[%c0_34, %c0_35] : memref<16x256xf32, #tpu.memory_space<vmem>>, vector<16x256xf32>
    %41 = arith.subf %40, %11 : vector<16x256xf32>
    %c0_36 = arith.constant 0 : index
    %c0_37 = arith.constant 0 : index
    %42 = vector.load %arg10[%c0_36, %c0_37] : memref<16x1xf32, #tpu.memory_space<vmem>>, vector<16x1xf32>
    %43 = arith.mulf %41, %41 : vector<16x256xf32>
    %cst_38 = arith.constant dense<0.000000e+00> : vector<16xf32>
    %44 = vector.multi_reduction <add>, %43, %cst_38 [1] : vector<16x256xf32> to vector<16xf32>
    %45 = vector.shape_cast %44 : vector<16xf32> to vector<16x1xf32>
    %46 = arith.addf %42, %45 : vector<16x1xf32>
    %c0_39 = arith.constant 0 : index
    %c0_40 = arith.constant 0 : index
    %47 = vector.load %arg10[%c0_39, %c0_40] : memref<16x1xf32, #tpu.memory_space<vmem>>, vector<16x1xf32>
    tpu.vector_store %arg10[%c0_39, %c0_40], %46 {strides = array<i32>} : memref<16x1xf32, #tpu.memory_space<vmem>>, vector<16x1xf32>,
    %c0_i32_41 = arith.constant 0 : i32
    %48 = arith.cmpi eq, %arg0, %c0_i32_41 : i32
    %49 = arith.extui %48 : i1 to i32
    %c0_i32_42 = arith.constant 0 : i32
    %50 = arith.cmpi ne, %49, %c0_i32_42 : i32
    scf.if %50 {
      %c0_43 = arith.constant 0 : index
      %c0_44 = arith.constant 0 : index
      %51 = vector.load %arg6[%c0_43, %c0_44] : memref<16x16xf32, #tpu.memory_space<vmem>>, vector<16x16xf32>
      %52 = tpu.iota {dimensions = array<i32: 0>} : vector<16x16xi32>
      %53 = tpu.iota {dimensions = array<i32: 1>} : vector<16x16xi32>
      %54 = arith.cmpi eq, %52, %53 : vector<16x16xi32>
      %cst_45 = arith.constant 0.000000e+00 : f32
      %55 = vector.broadcast %cst_45 : f32 to vector<16x16xf32>
      %56 = arith.select %54, %51, %55 : vector<16x16xi1>, vector<16x16xf32>
      %cst_46 = arith.constant dense<0.000000e+00> : vector<16xf32>
      %57 = vector.multi_reduction <add>, %56, %cst_46 [1] : vector<16x16xf32> to vector<16xf32>
      %58 = vector.shape_cast %57 : vector<16xf32> to vector<16x1xf32>
      %cst_47 = arith.constant dense<0.000000e+00> : vector<16xf32>
      %59 = vector.multi_reduction <add>, %56, %cst_47 [0] : vector<16x16xf32> to vector<16xf32>
      %60 = vector.shape_cast %59 : vector<16xf32> to vector<1x16xf32>
      %c0_48 = arith.constant 0 : index
      %c0_49 = arith.constant 0 : index
      %61 = vector.load %arg7[%c0_48, %c0_49] : memref<16x1xf32, #tpu.memory_space<vmem>>, vector<16x1xf32>
      %c0_50 = arith.constant 0 : index
      %c0_51 = arith.constant 0 : index
      %62 = vector.load %arg8[%c0_50, %c0_51] : memref<16x1xf32, #tpu.memory_space<vmem>>, vector<16x1xf32>
      %63 = arith.maximumf %61, %62 : vector<16x1xf32>
      %c0_52 = arith.constant 0 : index
      %c0_53 = arith.constant 0 : index
      %64 = vector.load %arg9[%c0_52, %c0_53] : memref<16x1xf32, #tpu.memory_space<vmem>>, vector<16x1xf32>
      %65 = arith.maximumf %63, %64 : vector<16x1xf32>
      %c0_54 = arith.constant 0 : index
      %c0_55 = arith.constant 0 : index
      %66 = vector.load %arg10[%c0_54, %c0_55] : memref<16x1xf32, #tpu.memory_space<vmem>>, vector<16x1xf32>
      %67 = arith.maximumf %65, %66 : vector<16x1xf32>
      %cst_56 = arith.constant 9.99999996E-13 : f32
      %68 = vector.broadcast %cst_56 : f32 to vector<16x1xf32>
      %69 = arith.maximumf %67, %68 : vector<16x1xf32>
      %70 = math.sqrt %69 : vector<16x1xf32>
      %71 = vector.broadcast %58 : vector<16x1xf32> to vector<16x16xf32>
      %72 = vector.broadcast %60 : vector<1x16xf32> to vector<16x16xf32>
      %73 = arith.addf %71, %72 : vector<16x16xf32>
      %cst_57 = arith.constant 2.000000e+00 : f32
      %74 = vector.broadcast %cst_57 : f32 to vector<16x16xf32>
      %75 = arith.mulf %74, %51 : vector<16x16xf32>
      %76 = arith.subf %73, %75 : vector<16x16xf32>
      %cst_58 = arith.constant 0x7F800000 : f32
      %77 = vector.broadcast %cst_58 : f32 to vector<16x16xf32>
      %78 = arith.select %54, %77, %76 : vector<16x16xi1>, vector<16x16xf32>
      %cst_59 = arith.constant dense<0x7F800000> : vector<16xf32>
      %79 = vector.multi_reduction <minimumf>, %78, %cst_59 [1] : vector<16x16xf32> to vector<16xf32>
      %80 = vector.shape_cast %79 : vector<16xf32> to vector<16x1xf32>
      %cst_60 = arith.constant 9.99999996E-13 : f32
      %81 = vector.broadcast %cst_60 : f32 to vector<16x1xf32>
      %82 = arith.maximumf %80, %81 : vector<16x1xf32>
      %83 = math.sqrt %82 : vector<16x1xf32>
      %84 = arith.subf %70, %83 : vector<16x1xf32>
      %cst_61 = arith.constant 1.000000e+01 : f32
      %85 = vector.broadcast %cst_61 : f32 to vector<16x1xf32>
      %86 = arith.addf %84, %85 : vector<16x1xf32>
      %cst_62 = arith.constant 0.000000e+00 : f32
      %87 = vector.broadcast %cst_62 : f32 to vector<16x1xf32>
      %88 = arith.maximumf %86, %87 : vector<16x1xf32>
      %cst_63 = arith.constant dense<0.000000e+00> : vector<1xf32>
      %89 = vector.multi_reduction <add>, %88, %cst_63 [0] : vector<16x1xf32> to vector<1xf32>
      %90 = vector.shape_cast %89 : vector<1xf32> to vector<1x1xf32>
      %cst_64 = arith.constant 6.250000e-02 : f32
      %91 = vector.broadcast %cst_64 : f32 to vector<1x1xf32>
      %92 = arith.mulf %90, %91 : vector<1x1xf32>
      %93 = tpu.iota {dimensions = array<i32: 1>} : vector<16x128xi32>
      %c0_i32_65 = arith.constant 0 : i32
      %94 = vector.broadcast %c0_i32_65 : i32 to vector<16x128xi32>
      %95 = arith.cmpi eq, %93, %94 : vector<16x128xi32>
      %c1_i32 = arith.constant 1 : i32
      %96 = vector.broadcast %c1_i32 : i32 to vector<16x128xi32>
      %97 = arith.cmpi eq, %93, %96 : vector<16x128xi32>
      %c2_i32 = arith.constant 2 : i32
      %98 = vector.broadcast %c2_i32 : i32 to vector<16x128xi32>
      %99 = arith.cmpi eq, %93, %98 : vector<16x128xi32>
      %cst_66 = arith.constant 0.000000e+00 : f32
      %100 = vector.shape_cast %92 : vector<1x1xf32> to vector<1x1xf32>
      %101 = vector.broadcast %100 : vector<1x1xf32> to vector<16x128xf32>
      %102 = vector.broadcast %cst_66 : f32 to vector<16x128xf32>
      %103 = arith.select %99, %101, %102 : vector<16x128xi1>, vector<16x128xf32>
      %104 = vector.shape_cast %83 : vector<16x1xf32> to vector<16x1xf32>
      %105 = vector.broadcast %104 : vector<16x1xf32> to vector<16x128xf32>
      %106 = arith.select %97, %105, %103 : vector<16x128xi1>, vector<16x128xf32>
      %107 = vector.shape_cast %70 : vector<16x1xf32> to vector<16x1xf32>
      %108 = vector.broadcast %107 : vector<16x1xf32> to vector<16x128xf32>
      %109 = arith.select %95, %108, %106 : vector<16x128xi1>, vector<16x128xf32>
      %c0_67 = arith.constant 0 : index
      %c0_68 = arith.constant 0 : index
      %110 = vector.load %arg5[%c0_67, %c0_68] : memref<16x128xf32, #tpu.memory_space<vmem>>, vector<16x128xf32>
      tpu.vector_store %arg5[%c0_67, %c0_68], %109 {strides = array<i32>} : memref<16x128xf32, #tpu.memory_space<vmem>>, vector<16x128xf32>,
    } else {
    }
    return
  }
  func.func @transform_0(%arg0: i32) -> (i32, i32) {
    %c0_i32 = arith.constant 0 : i32
    %0 = arith.addi %c0_i32, %arg0 : i32
    %c0_i32_0 = arith.constant 0 : i32
    %c0_i32_1 = arith.constant 0 : i32
    return %c0_i32_0, %0 : i32, i32
  }
  func.func @transform_1(%arg0: i32) -> (i32, i32) {
    %c1_i32 = arith.constant 1 : i32
    %0 = arith.addi %c1_i32, %arg0 : i32
    %c0_i32 = arith.constant 0 : i32
    %c0_i32_0 = arith.constant 0 : i32
    return %c0_i32, %0 : i32, i32
  }
  func.func @transform_2(%arg0: i32) -> (i32, i32) {
    %c2_i32 = arith.constant 2 : i32
    %0 = arith.addi %c2_i32, %arg0 : i32
    %c0_i32 = arith.constant 0 : i32
    %c0_i32_0 = arith.constant 0 : i32
    return %c0_i32, %0 : i32, i32
  }
  func.func @transform_3(%arg0: i32) -> (i32, i32) {
    %c3_i32 = arith.constant 3 : i32
    %0 = arith.addi %c3_i32, %arg0 : i32
    %c0_i32 = arith.constant 0 : i32
    %c0_i32_0 = arith.constant 0 : i32
    return %c0_i32, %0 : i32, i32
  }
  func.func @transform_4(%arg0: i32) -> (i32, i32) {
    %c0_i32 = arith.constant 0 : i32
    %c0_i32_0 = arith.constant 0 : i32
    %c0_i32_1 = arith.constant 0 : i32
    return %c0_i32, %c0_i32_0 : i32, i32
  }
}

</mosaic_0001>

<bundles_post_ra>
// kernel: tpu_custom_call.1
= control target key start
LH: loop header
LB: loop body
LE: loop exit
PB: predicated region body
PF: predicated region fallthrough
CT: control target
= control target key end

     0   :  { %9 = vsyncpa [#allocation8], 0  ;;  %s864_s0 = inlined_call_operand.hbm [shape: f32[16,1024], index: 0, kind: input, shape index: {}]   ;;  %s865_s1 = inlined_call_operand.hbm [shape: f32[16,1024], index: 1, kind: input, shape index: {}]   ;;  %s866_s2 = inlined_call_operand.hbm [shape: f32[16,1024], index: 2, kind: input, shape index: {}]   ;;  %s867_s3 = inlined_call_operand.hbm [shape: f32[16,1024], index: 3, kind: input, shape index: {}]   ;;  %s868_s4 = inlined_call_operand.hbm [shape: f32[16,128], index: 4, kind: output, shape index: {}]  }
   0x1   :  { %10 = vsyncpa [#allocation11], 0 }
   0x2   :  { %11 = vsyncpa [#allocation14], 0 }
   0x3   :  { %12 = vsyncpa [#allocation9], 0  ;;  %s663_s17 = scalar_lea.hbm %s865_s1, 256  ;;  %s623_s18 = smov [#allocation10]  }
   0x4   :  { %s34_s19 = sshll.u32 %s623_s18, 4  ;;  %s624_s20 = smov [#allocation7]   ;;  %s35_s19 = int_to_ptr.vmem [resolvable:$true] %s34_s19 }
   0x5   :  { %s18_s21 = sshll.u32 %s624_s20, 4  ;;  %s520_s24 = scalar_lea.hbm %s865_s1, 768  ;;  %s665_s21 = int_to_ptr.vmem [resolvable:$true] %s18_s21 }
   0x6   :  { %p497_p0 = scmp.ne.s32.totalorder %s663_s17, %s520_s24  ;;  %s498_s27 = scalar_lea.hbm %s865_s1, 2048 }
   0x7   :  { %p499_p1 = scmp.lt.u32.totalorder %s663_s17, %s865_s1  ;;  %p500_p2 = scmp.lt.u32.totalorder %s498_s27, %s520_s24 }
   0x8   :  { %p502_p4 = scmp.lt.u32.totalorder %s520_s24, %s663_s17 }
   0x9   :  { %p501_p3 = por %p500_p2, %p499_p1 }
   0xb   :  { %p503_p5 = por %p502_p4, %p501_p3 }
   0xd   :  { %p504_p6 = pnand %p503_p5, %p497_p0 }
   0xf   :  { %507 = shalt.err (!%p504_p6)
}
  0x10   :  { %s508_s30 = scalar_lea.vmem %s35_s19, 512  ;;  %p513_p8 = scmp.lt.s32.totalorder %s35_s19, %s35_s19 }
  0x11   :  { %p509_p7 = scmp.ne.s32.totalorder %s35_s19, %s508_s30  ;;  %p514_p9 = scmp.lt.s32.totalorder %s508_s30, %s508_s30 }
  0x13   :  { %p515_p10 = por %p514_p9, %p513_p8 }
  0x15   :  { %p516_p11 = pnand %p515_p10, %p509_p7 }
  0x17   :  { %519 = shalt.err (!%p516_p11)
}
  0x18   :  { %s625_s5 = smov 1024   ;;  %s626_s6 = smov 256  }
  0x19   :  { %s627_s7 = smov 16   ;;  %s521_s9 = scalar_lea.hbm %s864_s0, 512 }
  0x1a   :  { %40 = dma.hbm_to_vmem [thread:$0]  %s663_s17, 512, %s35_s19, [#allocation11], %s625_s5, %s626_s6, %s627_s7  }
  0x1b   :  { %p522_p12 = scmp.ne.s32.totalorder %s864_s0, %s521_s9  ;;  %s523_s14 = scalar_lea.hbm %s864_s0, 2048 }
  0x1c   :  { %p524_p13 = scmp.lt.u32.totalorder %s523_s14, %s521_s9  ;;  %p525_p0 = scmp.lt.u32.totalorder %s521_s9, %s864_s0 }
  0x1e   :  { %p526_p1 = por %p525_p0, %p524_p13 }
  0x20   :  { %p527_p2 = pnand %p526_p1, %p522_p12 }
  0x22   :  { %530 = shalt.err (!%p527_p2)
}
  0x23   :  { %s531_s17 = scalar_lea.vmem %s665_s21, 512  ;;  %p536_p4 = scmp.lt.s32.totalorder %s665_s21, %s665_s21 }
  0x24   :  { %p532_p3 = scmp.ne.s32.totalorder %s665_s21, %s531_s17  ;;  %p537_p5 = scmp.lt.s32.totalorder %s531_s17, %s531_s17 }
  0x26   :  { %p538_p6 = por %p537_p5, %p536_p4 }
  0x28   :  { %p539_p7 = pnand %p538_p6, %p532_p3 }
  0x2a   :  { %542 = shalt.err (!%p539_p7)
}
  0x2b   :  { %24 = dma.hbm_to_vmem [thread:$0]  %s864_s0, 512, %s665_s21, [#allocation8], %s625_s5, %s626_s6, %s627_s7  }
  0x2c   :  { %s466_s23 = scalar_lea.hbm %s866_s2, 512  ;;  %s628_s24 = smov [#allocation12]  }
  0x2d   :  { %s50_s25 = sshll.u32 %s628_s24, 4  ;;  %s712_s28 = scalar_lea.hbm %s867_s3, 768  ;;  %s51_s25 = int_to_ptr.vmem [resolvable:$true] %s50_s25 }
  0x2e   :  { %s567_s1 = scalar_lea.hbm %s866_s2, 1024  ;;  %s545_s0 = scalar_lea.hbm %s866_s2, 2048 }
  0x2f   :  { %p544_p8 = scmp.ne.s32.totalorder %s466_s23, %s567_s1  ;;  %p546_p9 = scmp.lt.u32.totalorder %s466_s23, %s866_s2 }
  0x30   :  { %p547_p10 = scmp.lt.u32.totalorder %s545_s0, %s567_s1  ;;  %p549_p12 = scmp.lt.u32.totalorder %s567_s1, %s466_s23 }
  0x32   :  { %p548_p11 = por %p547_p10, %p546_p9 }
  0x34   :  { %p550_p13 = por %p549_p12, %p548_p11 }
  0x36   :  { %p551_p0 = pnand %p550_p13, %p544_p8 }
  0x38   :  { %554 = shalt.err (!%p551_p0)
}
  0x39   :  { %s555_s11 = scalar_lea.vmem %s51_s25, 512  ;;  %p560_p2 = scmp.lt.s32.totalorder %s51_s25, %s51_s25 }
  0x3a   :  { %p556_p1 = scmp.ne.s32.totalorder %s51_s25, %s555_s11  ;;  %p561_p3 = scmp.lt.s32.totalorder %s555_s11, %s555_s11 }
  0x3c   :  { %p562_p4 = por %p561_p3, %p560_p2 }
  0x3e   :  { %p563_p5 = pnand %p562_p4, %p556_p1 }
  0x40   :  { %566 = shalt.err (!%p563_p5)
}
  0x41   :  { %56 = dma.hbm_to_vmem [thread:$0]  %s466_s23, 512, %s51_s25, [#allocation11], %s625_s5, %s626_s6, %s627_s7  }
  0x42   :  { %s629_s2 = smov [#allocation13]   ;;  %s592_s15 = scalar_lea.hbm %s867_s3, 1280 }
  0x43   :  { %s66_s12 = sshll.u32 %s629_s2, 4  ;;  %p569_p6 = scmp.ne.s32.totalorder %s712_s28, %s592_s15  ;;  %s67_s12 = int_to_ptr.vmem [resolvable:$true] %s66_s12 }
  0x44   :  { %s570_s18 = scalar_lea.hbm %s867_s3, 2048  ;;  %p571_p7 = scmp.lt.u32.totalorder %s712_s28, %s867_s3 }
  0x45   :  { %p572_p8 = scmp.lt.u32.totalorder %s570_s18, %s592_s15  ;;  %p574_p10 = scmp.lt.u32.totalorder %s592_s15, %s712_s28 }
  0x47   :  { %p573_p9 = por %p572_p8, %p571_p7 }
  0x49   :  { %p575_p11 = por %p574_p10, %p573_p9 }
  0x4b   :  { %p576_p12 = pnand %p575_p11, %p569_p6 }
  0x4d   :  { %579 = shalt.err (!%p576_p12)
}
  0x4e   :  { %s580_s22 = scalar_lea.vmem %s67_s12, 512  ;;  %p585_p0 = scmp.lt.s32.totalorder %s67_s12, %s67_s12 }
  0x4f   :  { %p581_p13 = scmp.ne.s32.totalorder %s67_s12, %s580_s22  ;;  %p586_p1 = scmp.lt.s32.totalorder %s580_s22, %s580_s22 }
  0x51   :  { %p587_p2 = por %p586_p1, %p585_p0 }
  0x53   :  { %p588_p3 = pnand %p587_p2, %p581_p13 }
  0x55   :  { %591 = shalt.err (!%p588_p3)
}
  0x56   :  { %72 = dma.hbm_to_vmem [thread:$0]  %s712_s28, 512, %s67_s12, [#allocation14], %s625_s5, %s626_s6, %s627_s7  }
  0x57   :  { %615 = dma.done.wait [#allocation8], 512  }
  0x58   :  { %616 = vsyncadd [#allocation8], 4294966784 }
  0x59   :  { %617 = dma.done.wait [#allocation11], 1024  }
  0x5a   :  { %618 = vsyncadd [#allocation11], 4294966272 }
  0x5b   :  { %619 = dma.done.wait [#allocation14], 512  }
  0x5c   :  { %620 = vsyncadd [#allocation14], 4294966784  ;;  %vm95_vm0 = vcmask 130048   ;;  %v630_v0 = vmov 0.0   ;;  %v108_v1 = vld [vmem:[#allocation7 + $0x8] sm:$0xff]  ;;  %v110_v2 = vld [vmem:[#allocation7 + $0x18] sm:$0xff]  ;;  %v323_v60 = vlaneseq }
  0x5d   :  { %96 = vst.msk [vmem:[#allocation2] sm:$0xff] %vm95_vm0, %v630_v0  ;;  %97 = vst.msk [vmem:[#allocation2 + $0x8] sm:$0xff] %vm95_vm0, %v630_v0  ;;  %v746_v3 = vld [vmem:[#allocation10 + $0x8] sm:$0xff]  ;;  %v114_v4 = vld [vmem:[#allocation10 + $0x18] sm:$0xff]  ;;  %vm98_vm3 = vcmask 7168   ;;  %s632_s3 = smov [#allocation15]  }
  0x5e   :  { %v116_v5 = vadd.f32 %v746_v3, %v108_v1  ;;  %v749_v6 = vld [vmem:[#allocation12 + $0x8] sm:$0xff]  ;;  %v122_v7 = vld [vmem:[#allocation12 + $0x18] sm:$0xff]  ;;  %v118_v8 = vadd.f32 %v114_v4, %v110_v2  ;;  %v107_v11 = vld [vmem:[#allocation7] sm:$0xff]  ;;  %99 = vst.msk [vmem:[#allocation3] sm:$0xff] %vm98_vm3, %v630_v0  ;;  %s451_s5 = sshll.u32 %s632_s3, 4  ;;  %s452_s5 = int_to_ptr.vmem [resolvable:$true] %s451_s5 }
  0x5f   :  { %v751_v9 = vld [vmem:[#allocation13 + $0x8] sm:$0xff]  ;;  %v130_v10 = vld [vmem:[#allocation13 + $0x18] sm:$0xff]  ;;  %v109_v13 = vld [vmem:[#allocation7 + $0x10] sm:$0xff]  ;;  %100 = vst.msk [vmem:[#allocation3 + $0x8] sm:$0xff] %vm98_vm3, %v630_v0  ;;  %s593_s6 = scalar_lea.vmem %s452_s5, 256  ;;  %p598_p5 = scmp.lt.s32.totalorder %s452_s5, %s452_s5 }
  0x60   :  { %v124_v12 = vadd.f32 %v749_v6, %v116_v5  ;;  %v754_v14 = vld [vmem:[#allocation10] sm:$0xff]  ;;  %v113_v15 = vld [vmem:[#allocation10 + $0x10] sm:$0xff]  ;;  %v126_v16 = vadd.f32 %v122_v7, %v118_v8  ;;  %101 = vst.msk [vmem:[#allocation4] sm:$0xff] %vm98_vm3, %v630_v0  ;;  %102 = vst.msk [vmem:[#allocation4 + $0x8] sm:$0xff] %vm98_vm3, %v630_v0  ;;  %p594_p4 = scmp.ne.s32.totalorder %s452_s5, %s593_s6  ;;  %p599_p6 = scmp.lt.s32.totalorder %s593_s6, %s593_s6 }
  0x61   :  { %v115_v17 = vadd.f32 %v754_v14, %v107_v11  ;;  %v117_v18 = vadd.f32 %v113_v15, %v109_v13  ;;  %v757_v19 = vld [vmem:[#allocation12] sm:$0xff]  ;;  %v121_v20 = vld [vmem:[#allocation12 + $0x10] sm:$0xff]  ;;  %103 = vst.msk [vmem:[#allocation5] sm:$0xff] %vm98_vm3, %v630_v0  ;;  %104 = vst.msk [vmem:[#allocation5 + $0x8] sm:$0xff] %vm98_vm3, %v630_v0 }
  0x62   :  { %v132_v21 = vadd.f32 %v751_v9, %v124_v12  ;;  %v760_v22 = vld [vmem:[#allocation13] sm:$0xff]  ;;  %v129_v23 = vld [vmem:[#allocation13 + $0x10] sm:$0xff]  ;;  %v134_v24 = vadd.f32 %v130_v10, %v126_v16  ;;  %105 = vst.msk [vmem:[#allocation6] sm:$0xff] %vm98_vm3, %v630_v0  ;;  %106 = vst.msk [vmem:[#allocation6 + $0x8] sm:$0xff] %vm98_vm3, %v630_v0  ;;  %p600_p7 = por %p599_p6, %p598_p5 }
  0x63   :  { %v123_v25 = vadd.f32 %v757_v19, %v115_v17  ;;  %v125_v26 = vadd.f32 %v121_v20, %v117_v18 }
  0x64   :  { %v763_v27 = vmul.f32 0.25, %v132_v21  ;;  %v138_v28 = vmul.f32 0.25, %v134_v24  ;;  %v139_v61 = vld [vmem:[#allocation2] sm:$0xff]  ;;  %v140_v62 = vld [vmem:[#allocation2 + $0x8] sm:$0xff]  ;;  %p601_p8 = pnand %p600_p7, %p594_p4 }
  0x65   :  { %v131_v29 = vadd.f32 %v760_v22, %v123_v25  ;;  %v133_v30 = vadd.f32 %v129_v23, %v125_v26 }
  0x66   :  { %205 = vmatprep.mubr.f32.mxu0 %v763_v27  ;;  %v468_v31 = vpack.c.bf16 %v138_v28, %v763_v27  ;;  %210 = vmatprep.mubr.f32.mxu1 %v138_v28  ;;  %v226_v36 = vsub.f32 %v108_v1, %v763_v27  ;;  %v228_v38 = vsub.f32 %v110_v2, %v138_v28  ;;  %v774_v2 = vshrl.u32 %v323_v60, 7 }
  0x67   :  { %v768_v32 = vmul.f32 0.25, %v131_v29  ;;  %v137_v33 = vmul.f32 0.25, %v133_v30  ;;  %v253_v44 = vsub.f32 %v114_v4, %v138_v28  ;;  %v277_v50 = vsub.f32 %v122_v7, %v138_v28 }
  0x68   :  { %469 = vmatprep.subr.bf16.mxu0 %v468_v31  ;;  %472 = vmatprep.subr.bf16.mxu1 %v468_v31  ;;  %v232_v40 = vmul.f32 %v226_v36, %v226_v36  ;;  %v234_v42 = vmul.f32 %v228_v38, %v228_v38  ;;  %v301_v55 = vsub.f32 %v130_v10, %v138_v28  ;;  %v778_v10 = vand.u32 127, %v323_v60  ;;  %v255_v38 = vld [vmem:[#allocation4 + $0x8] sm:$0xff] }
  0x69   :  { %v470_v34 = vpack.c.bf16 %v137_v33, %v768_v32  ;;  %v225_v35 = vsub.f32 %v107_v11, %v768_v32  ;;  %v227_v37 = vsub.f32 %v109_v13, %v137_v33  ;;  %v252_v43 = vsub.f32 %v113_v15, %v137_v33 }
  0x6a   :  { %v259_v47 = vmul.f32 %v253_v44, %v253_v44  ;;  %v276_v49 = vsub.f32 %v121_v20, %v137_v33  ;;  %v283_v53 = vmul.f32 %v277_v50, %v277_v50  ;;  %v300_v54 = vsub.f32 %v129_v23, %v137_v33 }
  0x6b   :  { %471 = vmatpush1.bf16.xpose.msra.mxu0 %v470_v34  ;;  %473 = vmatpush1.bf16.xpose.msra.mxu1 %v470_v34  ;;  %v231_v39 = vmul.f32 %v225_v35, %v225_v35  ;;  %v233_v41 = vmul.f32 %v227_v37, %v227_v37  ;;  %v258_v46 = vmul.f32 %v252_v43, %v252_v43  ;;  %v781_v11 = vadd.s32 8, %v774_v2  ;;  %v303_v43 = vld [vmem:[#allocation6 + $0x8] sm:$0xff] }
  0x6c   :  { %v282_v52 = vmul.f32 %v276_v49, %v276_v49  ;;  %v306_v57 = vmul.f32 %v300_v54, %v300_v54  ;;  %v307_v58 = vmul.f32 %v301_v55, %v301_v55  ;;  %vm328_vm1 = vcmp.eq.s32.totalorder %v774_v2, %v778_v10 }
  0x6d   :  { %v235_v45 = vadd.f32 %v232_v40, %v231_v39  ;;  %v238_v48 = vadd.f32 %v234_v42, %v233_v41  ;;  %v263_v51 = vadd.f32 %v259_v47, %v258_v46  ;;  %vm329_vm2 = vcmp.eq.s32.totalorder %v781_v11, %v778_v10  ;;  %v279_v41 = vld [vmem:[#allocation5 + $0x8] sm:$0xff] }
  0x6e   :  { %v287_v56 = vadd.f32 %v283_v53, %v282_v52  ;;  %v311_v59 = vadd.f32 %v307_v58, %v306_v57  ;;  %v250_v12 = vsub.f32 %v754_v14, %v768_v32  ;;  %v251_v13 = vsub.f32 %v746_v3, %v763_v27 }
  0x6f   :  { %236 = vadd.xlane.f32.xlu1 %v235_v45  ;;  %v274_v24 = vsub.f32 %v757_v19, %v768_v32  ;;  %v275_v25 = vsub.f32 %v749_v6, %v763_v27  ;;  %v298_v30 = vsub.f32 %v760_v22, %v768_v32  ;;  %v299_v31 = vsub.f32 %v751_v9, %v763_v27  ;;  %v229_v9 = vld [vmem:[#allocation3] sm:$0xff]  ;;  %v230_v22 = vld [vmem:[#allocation3 + $0x8] sm:$0xff] }
  0x70   :  { %v256_v21 = vmul.f32 %v250_v12, %v250_v12  ;;  %v257_v3 = vmul.f32 %v251_v13, %v251_v13  ;;  %v631_v39 = vmov 0   ;;  %v278_v12 = vld [vmem:[#allocation5] sm:$0xff]  ;;  %vm423_vm12 = vcmp.eq.s32.totalorder %v778_v10, 2 }
  0x71   :  { %v280_v28 = vmul.f32 %v274_v24, %v274_v24  ;;  %v281_v29 = vmul.f32 %v275_v25, %v275_v25  ;;  %v304_v34 = vmul.f32 %v298_v30, %v298_v30  ;;  %v305_v35 = vmul.f32 %v299_v31, %v299_v31  ;;  %487 = vset.pattern.permute.xlu1 %v631_v39 }
  0x72   :  { %206 = vmatmul.mubr.f32.vlgmr.msra.gmra.mrb[0].mxu0 %v768_v32  ;;  %211 = vmatmul.mubr.f32.vlgmr.msra.gmra.mrb[0].mxu1 %v137_v33  ;;  %v260_v26 = vadd.f32 %v257_v3, %v256_v21  ;;  %vm422_vm13 = vcmp.eq.s32.totalorder %v778_v10, 1  ;;  %vm421_vm14 = vcmp.eq.s32.totalorder %v778_v10, 0 }
  0x73   :  { %239 = vadd.xlane.f32.xlu1 %v238_v48  ;;  %v284_v33 = vadd.f32 %v281_v29, %v280_v28  ;;  %v308_v36 = vadd.f32 %v305_v35, %v304_v34  ;;  %486 = vset.pattern.permute.xlu0 %v631_v39 }
  0x77   :  { %264 = vadd.xlane.f32.xlu1 %v263_v51 }
  0x7b   :  { %288 = vadd.xlane.f32.xlu1 %v287_v56 }
  0x7f   :  { %312 = vadd.xlane.f32.xlu1 %v311_v59 }
  0xfc   :  { %v237_v19 = vpop.xlane.xlu1 %236 }
  0xfd   :  { %v241_v27 = vadd.f32 %v237_v19, %v229_v9 }
  0xff   :  { %244 = vst.msk [vmem:[#allocation3] sm:$0xff] %vm98_vm3, %v241_v27 }
 0x100   :  { %v240_v6 = vpop.xlane.xlu1 %239 }
 0x101   :  { %v242_v32 = vadd.f32 %v240_v6, %v230_v22 }
 0x103   :  { %245 = vst.msk [vmem:[#allocation3 + $0x8] sm:$0xff] %vm98_vm3, %v242_v32 }
 0x104   :  { %v265_v37 = vpop.xlane.xlu1 %264 }
 0x105   :  { %v267_v40 = vadd.f32 %v265_v37, %v255_v38 }
 0x107   :  { %269 = vst.msk [vmem:[#allocation4 + $0x8] sm:$0xff] %vm98_vm3, %v267_v40 }
 0x108   :  { %v289_v42 = vpop.xlane.xlu1 %288 }
 0x109   :  { %v291_v0 = vadd.f32 %v289_v42, %v279_v41 }
 0x10b   :  { %293 = vst.msk [vmem:[#allocation5 + $0x8] sm:$0xff] %vm98_vm3, %v291_v0 }
 0x10c   :  { %v313_v44 = vpop.xlane.xlu1 %312 }
 0x10d   :  { %v315_v45 = vadd.f32 %v313_v44, %v303_v43 }
 0x10f   :  { %317 = vst.msk [vmem:[#allocation6 + $0x8] sm:$0xff] %vm98_vm3, %v315_v45 }
 0x116   :  { %v356_v21 = vld [vmem:[#allocation6 + $0x8] sm:$0xff] }
 0x145   :  { %v207_v63 = vpop.f32.mrb[0].mxu0  ;;  %v212_v1 = vpop.f32.mrb[0].mxu1 }
 0x146   :  { %v216_v4 = vadd.f32 %v207_v63, %v139_v61  ;;  %v217_v5 = vadd.f32 %v212_v1, %v140_v62  ;;  %v209_v7 = vpop.f32.mrb[1].mxu0  ;;  %v214_v8 = vpop.f32.mrb[1].mxu1  ;;  %v254_v61 = vld [vmem:[#allocation4] sm:$0xff]  ;;  %v346_v1 = vld [vmem:[#allocation3 + $0x8] sm:$0xff] }
 0x148   :  { %219 = vst.msk [vmem:[#allocation2] sm:$0xff] %vm95_vm0, %v216_v4  ;;  %220 = vst.msk [vmem:[#allocation2 + $0x8] sm:$0xff] %vm95_vm0, %v217_v5  ;;  %v348_v4 = vld [vmem:[#allocation4 + $0x8] sm:$0xff] }
 0x149   :  { %v350_v2 = vmax.f32 %v346_v1, %v348_v4 }
 0x14f   :  { %v791_v15 = vld [vmem:[#allocation2] sm:$0xff]  ;;  %v793_v16 = vld [vmem:[#allocation2 + $0x8] sm:$0xff] }
 0x150   :  { %v330_v17 = vsel %vm328_vm1, %v791_v15, 0.0  ;;  %v331_v18 = vsel %vm329_vm2, %v793_v16, 0.0  ;;  %v377_v53 = vmul.f32 2.0, %v791_v15  ;;  %v378_v57 = vmul.f32 2.0, %v793_v16  ;;  %v352_v15 = vld [vmem:[#allocation5 + $0x8] sm:$0xff] }
 0x151   :  { %v332_v20 = vsel %vm95_vm0, %v330_v17, 0.0  ;;  %v335_v14 = vsel %vm95_vm0, %v331_v18, 0.0  ;;  %v302_v17 = vld [vmem:[#allocation6] sm:$0xff]  ;;  %v354_v18 = vmax.f32 %v350_v2, %v352_v15 }
 0x152   :  { %333 = vadd.xlane.f32.xlu0 %v332_v20  ;;  %v338_v23 = vadd.f32 %v335_v14, %v332_v20 }
 0x153   :  { %v358_v24 = vmax.f32 %v354_v18, %v356_v21 }
 0x154   :  { %v339_v46 = vrot.slane %v338_v23, 4 }
 0x155   :  { %v360_v28 = vmax.f32 %v358_v24, 1e-12 }
 0x156   :  { %336 = vadd.xlane.f32.xlu0 %v335_v14  ;;  %v340_v47 = vadd.f32 %v339_v46, %v338_v23  ;;  %v345_v14 = vld [vmem:[#allocation3] sm:$0xff] }
 0x157   :  { %488 = vrsqrt.f32 %v360_v28  ;;  %vm370_vm5 = vcmp.eq.f32.partialorder %v360_v28, inf  ;;  %v373_v6 = vand.u32 2147483648, %v360_v28  ;;  %vm372_vm7 = vcmp.eq.f32.partialorder %v360_v28, 0.0 }
 0x158   :  { %v341_v48 = vrot.slane %v340_v47, 2 }
 0x15a   :  { %261 = vadd.xlane.f32.xlu0 %v260_v26  ;;  %v342_v49 = vadd.f32 %v341_v48, %v340_v47 }
 0x15c   :  { %v343_v50 = vrot.slane %v342_v49, 1 }
 0x15e   :  { %285 = vadd.xlane.f32.xlu0 %v284_v33  ;;  %v344_v51 = vadd.f32 %v343_v50, %v342_v49 }
 0x161   :  { %v489_v33 = vpop.eup %488 }
 0x162   :  { %309 = vadd.xlane.f32.xlu0 %v308_v36  ;;  %v369_v34 = vmul.f32 %v489_v33, %v360_v28 }
 0x164   :  { %v371_v22 = vsel %vm370_vm5, %v360_v28, %v369_v34 }
 0x165   :  { %v374_v32 = vsel %vm372_vm7, %v373_v6, %v371_v22 }
 0x1df   :  { %v334_v52 = vpop.xlane.xlu0 %333 }
 0x1e0   :  { %v375_v54 = vadd.f32 %v344_v51, %v334_v52 }
 0x1e2   :  { %v379_v55 = vsub.f32 %v375_v54, %v377_v53 }
 0x1e3   :  { %v337_v56 = vpop.xlane.xlu0 %336 }
 0x1e4   :  { %v376_v58 = vadd.f32 %v344_v51, %v337_v56  ;;  %v381_v59 = vsel %vm328_vm1, inf, %v379_v55 }
 0x1e5   :  { %v383_v60 = vsel %vm95_vm0, %v381_v59, inf }
 0x1e6   :  { %v380_v62 = vsub.f32 %v376_v58, %v378_v57  ;;  %384 = vmin.xlane.f32.xlu0 %v383_v60 }
 0x1e7   :  { %v262_v63 = vpop.xlane.xlu0 %261 }
 0x1e8   :  { %v382_v5 = vsel %vm329_vm2, inf, %v380_v62  ;;  %v266_v7 = vadd.f32 %v262_v63, %v254_v61 }
 0x1e9   :  { %v386_v8 = vsel %vm95_vm0, %v382_v5, inf }
 0x1ea   :  { %387 = vmin.xlane.f32.xlu1 %v386_v8  ;;  %268 = vst.msk [vmem:[#allocation4] sm:$0xff] %vm98_vm3, %v266_v7 }
 0x1eb   :  { %v286_v13 = vpop.xlane.xlu0 %285 }
 0x1ec   :  { %v290_v16 = vadd.f32 %v286_v13, %v278_v12 }
 0x1ee   :  { %292 = vst.msk [vmem:[#allocation5] sm:$0xff] %vm98_vm3, %v290_v16 }
 0x1ef   :  { %v310_v20 = vpop.xlane.xlu0 %309 }
 0x1f0   :  { %v314_v11 = vadd.f32 %v310_v20, %v302_v17 }
 0x1f1   :  { %v347_v3 = vld [vmem:[#allocation4] sm:$0xff] }
 0x1f2   :  { %316 = vst.msk [vmem:[#allocation6] sm:$0xff] %vm98_vm3, %v314_v11  ;;  %v349_v23 = vmax.f32 %v345_v14, %v347_v3 }
 0x1f5   :  { %v351_v25 = vld [vmem:[#allocation5] sm:$0xff] }
 0x1f6   :  { %v353_v26 = vmax.f32 %v349_v23, %v351_v25 }
 0x1f9   :  { %v355_v29 = vld [vmem:[#allocation6] sm:$0xff] }
 0x1fa   :  { %v357_v30 = vmax.f32 %v353_v26, %v355_v29 }
 0x1fc   :  { %v359_v31 = vmax.f32 %v357_v30, 1e-12 }
 0x1fe   :  { %490 = vrsqrt.f32 %v359_v31  ;;  %vm363_vm4 = vcmp.eq.f32.partialorder %v359_v31, inf  ;;  %v366_v36 = vand.u32 2147483648, %v359_v31  ;;  %vm365_vm6 = vcmp.eq.f32.partialorder %v359_v31, 0.0 }
 0x208   :  { %v491_v35 = vpop.eup %490 }
 0x209   :  { %v362_v19 = vmul.f32 %v491_v35, %v359_v31 }
 0x20b   :  { %v364_v9 = vsel %vm363_vm4, %v359_v31, %v362_v19 }
 0x20c   :  { %v367_v27 = vsel %vm365_vm6, %v366_v36, %v364_v9 }
 0x20d   :  { %434 = vperm.xlu1 %487, %v367_v27  }
 0x211   :  { %439 = vperm.xlu1 %487, %v374_v32  }
 0x273   :  { %v385_v37 = vpop.xlane.xlu0 %384 }
 0x274   :  { %v389_v38 = vmax.f32 %v385_v37, 1e-12 }
 0x276   :  { %492 = vrsqrt.f32 %v389_v38  ;;  %vm393_vm8 = vcmp.eq.f32.partialorder %v389_v38, inf  ;;  %v396_v0 = vand.u32 2147483648, %v389_v38  ;;  %vm395_vm9 = vcmp.eq.f32.partialorder %v389_v38, 0.0 }
 0x277   :  { %v388_v39 = vpop.xlane.xlu1 %387 }
 0x278   :  { %v390_v40 = vmax.f32 %v388_v39, 1e-12 }
 0x27a   :  { %494 = vrsqrt.f32 %v390_v40  ;;  %vm400_vm10 = vcmp.eq.f32.partialorder %v390_v40, inf  ;;  %v403_v48 = vand.u32 2147483648, %v390_v40  ;;  %vm402_vm11 = vcmp.eq.f32.partialorder %v390_v40, 0.0 }
 0x280   :  { %v493_v41 = vpop.eup %492 }
 0x281   :  { %v392_v42 = vmul.f32 %v493_v41, %v389_v38 }
 0x283   :  { %v394_v43 = vsel %vm393_vm8, %v389_v38, %v392_v42 }
 0x284   :  { %v495_v44 = vpop.eup %494  ;;  %v397_v45 = vsel %vm395_vm9, %v396_v0, %v394_v43 }
 0x285   :  { %v399_v46 = vmul.f32 %v495_v44, %v390_v40  ;;  %v405_v47 = vsub.f32 %v367_v27, %v397_v45 }
 0x287   :  { %v401_v49 = vsel %vm400_vm10, %v390_v40, %v399_v46  ;;  %v407_v50 = vadd.f32 10.0, %v405_v47 }
 0x288   :  { %v404_v51 = vsel %vm402_vm11, %v403_v48, %v401_v49 }
 0x289   :  { %v406_v52 = vsub.f32 %v374_v32, %v404_v51  ;;  %v409_v54 = vmax.f32 %v407_v50, 0.0 }
 0x28b   :  { %v408_v53 = vadd.f32 10.0, %v406_v52  ;;  %v411_v56 = vsel %vm98_vm3, %v409_v54, 0.0 }
 0x28c   :  { %v435_v5 = vpop.permute.xlu1 %434 }
 0x28d   :  { %v410_v55 = vmax.f32 %v408_v53, 0.0 }
 0x28f   :  { %v412_v57 = vsel %vm98_vm3, %v410_v55, 0.0 }
 0x290   :  { %v413_v58 = vadd.f32 %v412_v57, %v411_v56  ;;  %v440_v12 = vpop.permute.xlu1 %439 }
 0x292   :  { %v414_v59 = vrot.slane %v413_v58, 4 }
 0x294   :  { %v415_v60 = vadd.f32 %v414_v59, %v413_v58 }
 0x296   :  { %v416_v61 = vrot.slane %v415_v60, 2 }
 0x298   :  { %v417_v62 = vadd.f32 %v416_v61, %v415_v60 }
 0x29a   :  { %v418_v63 = vrot.slane %v417_v62, 1 }
 0x29c   :  { %v419_v1 = vadd.f32 %v418_v63, %v417_v62 }
 0x29e   :  { %v420_v4 = vmul.f32 0.0625, %v419_v1 }
 0x2a0   :  { %426 = vperm.xlu0 %486, %v420_v4  }
 0x31f   :  { %v427_v7 = vpop.permute.xlu0 %426 }
 0x320   :  { %v429_v8 = vsel %vm423_vm12, %v427_v7, 0.0 }
 0x321   :  { %v430_v2 = vsel %vm422_vm13, %v397_v45, %v429_v8  ;;  %v431_v13 = vsel %vm422_vm13, %v404_v51, %v429_v8 }
 0x322   :  { %v442_v15 = vsel %vm421_vm14, %v435_v5, %v430_v2  ;;  %v443_v16 = vsel %vm421_vm14, %v440_v12, %v431_v13 }
 0x323   :  { %444 = vst [vmem:[#allocation15] sm:$0xff] %v442_v15  ;;  %445 = vst [vmem:[#allocation15 + $0x8] sm:$0xff] %v443_v16 }
 0x324   :  { %604 = shalt.err (!%p601_p8)
}
 0x325   :  { %s605_s24 = scalar_lea.hbm %s868_s4, 256 }
 0x326   :  { %p606_p9 = scmp.ne.s32.totalorder %s868_s4, %s605_s24  ;;  %p609_p10 = scmp.lt.u32.totalorder %s605_s24, %s868_s4 }
 0x328   :  { %p611_p11 = pnand %p609_p10, %p606_p9 }
 0x32a   :  { %614 = shalt.err (!%p611_p11)
}
 0x32b   :  { %s633_s29 = smov 128   ;;  %s634_s30 = smov 8  }
 0x32c   :  { %457 = dma.vmem_to_hbm [thread:$0]  %s452_s5, 256, %s868_s4, [#allocation9], %s633_s29, %s633_s29, %s634_s30  }
 0x32d   :  { %621 = dma.done.wait [#allocation9], 256  }
 0x32e   :  { %622 = vsyncadd [#allocation9], 4294967040 }
 0x32f   :  { %461 = vsyncpa [#allocation8], 1 }
 0x330   :  { %462 = vsyncpa [#allocation11], 1 }
 0x331   :  { %463 = vsyncpa [#allocation14], 1 }
 0x332   :  { %464 = vsyncpa [#allocation9], 1 }

</bundles_post_ra>
